<compile_context>
chip_gen: v7x
topology: tpu7x:2x2x1
jax: 0.10.0
libtpu: 0.0.40
codegen_flags: <defaults>
</compile_context>

<pallas_src>
import functools

import jax
import jax.numpy as jnp
from jax.experimental import pallas as pl
from jax.experimental.pallas import tpu as pltpu

EPS = 1e-5
LANE = 128     # lane width / channel padding granularity
TM = 128       # node-row tile (keep 128; on single-TC v6e, 256 is a reasonable sweep point)
TK_MAX = 512   # adjacency K-tile target (sweep 256-1024)


def _round_up(a, b):
    return ((a + b - 1) // b) * b


def _pick_tk(n_pad):
    """Largest multiple of TM that divides n_pad and is <= TK_MAX."""
    tk = min(TK_MAX, n_pad)
    while n_pad % tk:
        tk -= TM
    return tk


# -----------------------------------------------------------------------------
# Pass 1: GraphConv  h = x_i @ W_root + (A @ x)_i @ W_rel   (optionally with the previous
# layer's BN affine + ReLU fused into every x tile load) + masked per-row-tile BN partial
# sums (sum(h), sum(h*h)).
# Grid: (row tiles [parallel], adjacency K tiles [arbitrary, reduction last]).
# -----------------------------------------------------------------------------
def _gc_pass1_kernel(n_ref, a_ref, x_ref, wr_ref, wn_ref, sc_ref, sh_ref,
                     h_ref, stats_ref, acc_ref, *, tm, tk, fuse_input_bn):
    # NOTE: grid indices are read here (top level) and only closed over inside pl.when
    # bodies -- pallas primitives inside cond branches do not lower on the interpret path.
    i = pl.program_id(0)
    k = pl.program_id(1)
    nk = pl.num_programs(1)
    n_real = n_ref[0]

    @pl.when(k == 0)
    def _():
        acc_ref[...] = jnp.zeros_like(acc_ref)

    def load_rows(start, rows):
        xt = x_ref[pl.ds(start, rows), :]
        if fuse_input_bn:
            # Previous layer's BatchNorm affine + ReLU applied on the fly (cheap VPU work
            # under the MXU-bound aggregation; saves an HBM round trip of the normalized
            # intermediate).
            xt = jnp.maximum(xt.astype(jnp.float32) * sc_ref[...] + sh_ref[...], 0.0)
            xt = xt.astype(jnp.bfloat16)
        return xt

    # 'add' neighbor aggregation: acc += A[i-tile, k-tile] @ x[k-tile]   (bf16 MXU, f32 acc)
    acc_ref[...] += jnp.dot(a_ref[...], load_rows(k * tk, tk),
                            preferred_element_type=jnp.float32)

    @pl.when(k == nk - 1)
    def _():
        xi = load_rows(i * tm, tm)
        # Two accumulating matmuls (no in-kernel concatenate). GraphConv's bias is dropped
        # on purpose: it is exactly cancelled by the following BatchNorm mean subtraction.
        h = (jnp.dot(xi, wr_ref[...], preferred_element_type=jnp.float32)
             + jnp.dot(acc_ref[...].astype(jnp.bfloat16), wn_ref[...],
                       preferred_element_type=jnp.float32))
        h_ref[...] = h.astype(h_ref.dtype)

        # Streamed BN partial statistics in f32 (padded node rows masked out).
        row = jax.lax.broadcasted_iota(jnp.int32, (tm, 1), 0) + i * tm
        hm = jnp.where(row < n_real, h, 0.0)
        stats_ref[0] = jnp.concatenate(
            [jnp.sum(hm, axis=0, keepdims=True),
             jnp.sum(hm * hm, axis=0, keepdims=True)], axis=0)


def gc_pass1(x, adj, w_root, w_rel, in_scale, in_shift, n_arr, *, tm, tk, fuse_input_bn):
    """Raw GraphConv + streamed BN stats on padded, lane-dense operands.

    x: [N_pad, C_in_pad] bf16 (raw previous-layer h when fuse_input_bn);
    adj: [N_pad, N_pad] bf16;  w_root/w_rel: [C_in_pad, C_out_pad] bf16;
    in_scale/in_shift: [1, C_in_pad] f32;  n_arr: [1] int32 (real node count).
    Returns h [N_pad, C_out_pad] bf16 and stats [num_row_tiles, 2, C_out_pad] f32.
    """
    n_pad, c_in_pad = x.shape
    c_out_pad = w_root.shape[1]
    num_i = n_pad // tm
    num_k = n_pad // tk

    # Double-buffered VMEM estimate; explicit limit, capped v7x-safe (<= 60 MiB).
    vmem_est = (2 * tm * tk * 2                      # A tiles
                + 2 * n_pad * c_in_pad * 2           # resident x
                + 4 * c_in_pad * c_out_pad * 2       # W_root + W_rel
                + 4 * c_in_pad * 4                   # scale/shift
                + 2 * tm * c_out_pad * 2             # h out block
                + 4 * c_out_pad * 4                  # stats out block
                + tm * c_in_pad * 4)                 # acc scratch
    vmem_limit = int(min(max(2 * vmem_est, 32 * 1024 * 1024), 60 * 1024 * 1024))

    h, stats = pl.pallas_call(
        functools.partial(_gc_pass1_kernel, tm=tm, tk=tk, fuse_input_bn=fuse_input_bn),
        out_shape=[
            jax.ShapeDtypeStruct((n_pad, c_out_pad), jnp.bfloat16),
            jax.ShapeDtypeStruct((num_i, 2, c_out_pad), jnp.float32),
        ],
        grid_spec=pltpu.PrefetchScalarGridSpec(
            num_scalar_prefetch=1,
            grid=(num_i, num_k),
            in_specs=[
                pl.BlockSpec((tm, tk), lambda i, k, n_ref: (i, k)),               # A (streamed)
                pl.BlockSpec((n_pad, c_in_pad), lambda i, k, n_ref: (0, 0)),      # x (resident)
                pl.BlockSpec((c_in_pad, c_out_pad), lambda i, k, n_ref: (0, 0)),  # W_root
                pl.BlockSpec((c_in_pad, c_out_pad), lambda i, k, n_ref: (0, 0)),  # W_rel
                pl.BlockSpec((1, c_in_pad), lambda i, k, n_ref: (0, 0)),          # in_scale
                pl.BlockSpec((1, c_in_pad), lambda i, k, n_ref: (0, 0)),          # in_shift
            ],
            out_specs=[
                pl.BlockSpec((tm, c_out_pad), lambda i, k, n_ref: (i, 0)),
                pl.BlockSpec((1, 2, c_out_pad), lambda i, k, n_ref: (i, 0, 0)),
            ],
            scratch_shapes=[pltpu.VMEM((tm, c_in_pad), jnp.float32)],
        ),
        compiler_params=pltpu.CompilerParams(
            dimension_semantics=("parallel", "arbitrary"),
            vmem_limit_bytes=vmem_limit),
    )(n_arr, adj, x, w_root, w_rel, in_scale, in_shift)
    return h, stats


# -----------------------------------------------------------------------------
# Final per-tile BN affine + ReLU (only for the last layer; layer 1's is fused into
# layer 2's load path).
# -----------------------------------------------------------------------------
def _affine_relu_kernel(h_ref, sc_ref, sh_ref, o_ref):
    o_ref[...] = jnp.maximum(
        h_ref[...].astype(jnp.float32) * sc_ref[...] + sh_ref[...], 0.0
    ).astype(o_ref.dtype)


def affine_relu(h, scale, shift, out_dtype, tm=TM):
    n_pad, c_pad = h.shape
    return pl.pallas_call(
        _affine_relu_kernel,
        out_shape=jax.ShapeDtypeStruct((n_pad, c_pad), out_dtype),
        grid_spec=pltpu.PrefetchScalarGridSpec(
            num_scalar_prefetch=0,
            grid=(n_pad // tm,),
            in_specs=[pl.BlockSpec((tm, c_pad), lambda i: (i, 0)),
                      pl.BlockSpec((1, c_pad), lambda i: (0, 0)),
                      pl.BlockSpec((1, c_pad), lambda i: (0, 0))],
            out_specs=pl.BlockSpec((tm, c_pad), lambda i: (i, 0)),
        ),
        compiler_params=pltpu.CompilerParams(dimension_semantics=("parallel",)),
    )(h, scale, shift)


def _bn_scale_shift(stats, gamma_pad, beta_pad, n_real):
    """Finalize BatchNorm: fold mean/var/gamma/beta into per-channel (scale, shift)."""
    # TODO(synk): E[h^2]-E[h]^2 can cancel catastrophically for large-mean activations;
    # switch to a shifted two-pass formulation if BN-sensitive.
    s = jnp.sum(stats, axis=0)                                 # [2, C]
    mean = s[0] / n_real
    var = jnp.maximum(s[1] / n_real - mean * mean, 0.0)        # biased (training-mode) var
    scale = gamma_pad * jax.lax.rsqrt(var + EPS)
    shift = beta_pad - mean * scale
    return scale[None, :], shift[None, :]                      # [1, C] each


def _prep_layer_params(p, c_in_pad, c_out_pad):
    """Zero-pad channels to lane multiples; weights in bf16. Bias is intentionally not
    used by the kernel (cancelled exactly by BatchNorm's mean subtraction)."""
    c_in, c_out = p["w_root"].shape
    wr = jnp.zeros((c_in_pad, c_out_pad), jnp.float32).at[:c_in, :c_out].set(p["w_root"])
    wn = jnp.zeros((c_in_pad, c_out_pad), jnp.float32).at[:c_in, :c_out].set(p["w_rel"])
    g = jnp.zeros((c_out_pad,), jnp.float32).at[:c_out].set(p["gamma"])   # 0 in pad lanes
    b = jnp.zeros((c_out_pad,), jnp.float32).at[:c_out].set(p["beta"])
    return wr.astype(jnp.bfloat16), wn.astype(jnp.bfloat16), g, b


def conv_layer_forward(x_list, edge_index, params1, params2):
    """ConvLayer.forward: x = cat(x_list, 1); x = GraphConvBn1(x); x = GraphConvBn2(x)."""
    x = jnp.concatenate(x_list, axis=1)
    n, c_in = x.shape
    c1 = params1["w_root"].shape[1]
    c2 = params2["w_root"].shape[1]

    n_pad = _round_up(n, TM)
    tk = _pick_tk(n_pad)
    c_in_pad = _round_up(c_in, LANE)
    c1_pad = _round_up(c1, LANE)
    c2_pad = _round_up(c2, LANE)

    # Dense 'add'-aggregation adjacency A[i, j] = #edges j->i, built directly in bf16
    # (exact for per-pair multiplicities <= 256) and shared by both layers.
    src, dst = edge_index[0], edge_index[1]
    adj = jnp.zeros((n_pad, n_pad), jnp.bfloat16).at[dst, src].add(
        jnp.asarray(1.0, jnp.bfloat16))

    x_pad = jnp.zeros((n_pad, c_in_pad), jnp.bfloat16).at[:n, :c_in].set(
        x.astype(jnp.bfloat16))

    w1r, w1n, g1, be1 = _prep_layer_params(params1, c_in_pad, c1_pad)
    w2r, w2n, g2, be2 = _prep_layer_params(params2, c1_pad, c2_pad)

    n_arr = jnp.array([n], jnp.int32)                     # SMEM scalar (no per-n recompile)
    no_scale = jnp.ones((1, c_in_pad), jnp.float32)       # placeholders (unused, layer 1)
    no_shift = jnp.zeros((1, c_in_pad), jnp.float32)

    # Layer 1: raw GraphConv + streamed BN stats. h1 kept as raw bf16; its BN + ReLU is
    # fused into layer 2's tile loads.
    h1, stats1 = gc_pass1(x_pad, adj, w1r, w1n, no_scale, no_shift, n_arr,
                          tm=TM, tk=tk, fuse_input_bn=False)
    scale1, shift1 = _bn_scale_shift(stats1, g1, be1, n)

    # Layer 2: applies layer-1 BN affine + ReLU to every loaded x tile, then GraphConv +
    # streamed BN stats.
    h2, stats2 = gc_pass1(h1, adj, w2r, w2n, scale1, shift1, n_arr,
                          tm=TM, tk=tk, fuse_input_bn=True)
    scale2, shift2 = _bn_scale_shift(stats2, g2, be2, n)

    out = affine_relu(h2, scale2, shift2, jnp.float32)
    return out[:n, :c2]


def reference(x_list, edge_index, params1, params2):
    """Pure-JAX f32 reference matching the PyTorch module semantics (with bias)."""
    x = jnp.concatenate(x_list, axis=1)
    n = x.shape[0]
    src, dst = edge_index[0], edge_index[1]
    adj = jnp.zeros((n, n), jnp.float32).at[dst, src].add(1.0)

    def gcbn(xx, p):
        h = xx @ p["w_root"] + (adj @ xx) @ p["w_rel"] + p["b"][None, :]
        mean = h.mean(0, keepdims=True)
        var = ((h - mean) ** 2).mean(0, keepdims=True)
        y = (h - mean) * jax.lax.rsqrt(var + EPS) * p["gamma"][None, :] + p["beta"][None, :]
        return jnp.maximum(y, 0.0)

    return gcbn(gcbn(x, params1), params2)


if __name__ == "__main__":
    key = jax.random.PRNGKey(0)
    ks = jax.random.split(key, 4)

    # Small shapes consistent with ConvLayer(num_input_features=32, growth_rate=32, bn_size=4).
    N, C_IN, E = 200, 32, 400
    GROWTH, BN_SIZE = 32, 4
    C1 = GROWTH * BN_SIZE   # 128
    C2 = GROWTH             # 32

    x = jax.random.normal(ks[0], (N, C_IN), jnp.float32)
    edge_index = jax.random.randint(ks[1], (2, E), 0, N, dtype=jnp.int32)

    def init_gcbn(k, c_in, c_out):
        k1, k2, k3, k4, k5 = jax.random.split(k, 5)
        return dict(
            w_root=jax.random.normal(k1, (c_in, c_out), jnp.float32) * 0.1,
            w_rel=jax.random.normal(k2, (c_in, c_out), jnp.float32) * 0.1,
            b=jax.random.normal(k3, (c_out,), jnp.float32) * 0.1,
            gamma=1.0 + 0.1 * jax.random.normal(k4, (c_out,), jnp.float32),
            beta=0.1 * jax.random.normal(k5, (c_out,), jnp.float32),
        )

    params1 = init_gcbn(ks[2], C_IN, C1)
    params2 = init_gcbn(ks[3], C1, C2)

    out = conv_layer_forward([x], edge_index, params1, params2)
    out = jax.block_until_ready(out)

    ref = reference([x], edge_index, params1, params2)
    assert out.shape == (N, C2)
    # bf16 MXU operands + bf16 intermediate vs f32 reference after two BatchNorms.
    max_err = float(jnp.max(jnp.abs(out - ref)))
    mean_err = float(jnp.mean(jnp.abs(out - ref)))
    assert max_err < 1.5e-1 and mean_err < 2.5e-2, (
        f"error too large: max={max_err}, mean={mean_err}")
    print("KERNEL_OK")
</pallas_src>

<mosaic_0001>
module attributes {stable_mosaic.version = 11 : i64} {
  func.func @_gc_pass1_kernel(%arg0: i32, %arg1: i32, %arg2: memref<1xi32, #tpu.memory_space<smem>>, %arg3: memref<128x256xbf16, #tpu.memory_space<vmem>>, %arg4: memref<256x128xbf16, #tpu.memory_space<vmem>>, %arg5: memref<128x128xbf16, #tpu.memory_space<vmem>>, %arg6: memref<128x128xbf16, #tpu.memory_space<vmem>>, %arg7: memref<1x128xf32, #tpu.memory_space<vmem>>, %arg8: memref<1x128xf32, #tpu.memory_space<vmem>>, %arg9: memref<128x128xbf16, #tpu.memory_space<vmem>>, %arg10: memref<1x2x128xf32, #tpu.memory_space<vmem>>, %arg11: memref<128x128xf32, #tpu.memory_space<vmem>>) attributes {dimension_semantics = [#tpu.dimension_semantics<parallel>, #tpu.dimension_semantics<arbitrary>], iteration_bounds = array<i64: 2, 1>, scalar_prefetch = 1 : i64, scratch_operands = 1 : i64, tpu.core_type = #tpu.core_type<tc>, window_params = [{transform_indices = @transform_0, window_bounds = array<i64: 128, 256>}, {pipeline_mode = #tpu.pipeline_mode<synchronous>, transform_indices = @transform_1, window_bounds = array<i64: 256, 128>}, {pipeline_mode = #tpu.pipeline_mode<synchronous>, transform_indices = @transform_2, window_bounds = array<i64: 128, 128>}, {pipeline_mode = #tpu.pipeline_mode<synchronous>, transform_indices = @transform_3, window_bounds = array<i64: 128, 128>}, {pipeline_mode = #tpu.pipeline_mode<synchronous>, transform_indices = @transform_4, window_bounds = array<i64: 1, 128>}, {pipeline_mode = #tpu.pipeline_mode<synchronous>, transform_indices = @transform_5, window_bounds = array<i64: 1, 128>}, {transform_indices = @transform_6, window_bounds = array<i64: 128, 128>}, {transform_indices = @transform_7, window_bounds = array<i64: 1, 2, 128>}]} {
    %c0 = arith.constant 0 : index
    %0 = memref.load %arg2[%c0] : memref<1xi32, #tpu.memory_space<smem>>
    %c0_i32 = arith.constant 0 : i32
    %1 = arith.cmpi eq, %arg1, %c0_i32 : i32
    %2 = arith.extui %1 : i1 to i32
    %c0_i32_0 = arith.constant 0 : i32
    %3 = arith.cmpi ne, %2, %c0_i32_0 : i32
    scf.if %3 {
      %cst_10 = arith.constant 0.000000e+00 : f32
      %15 = vector.broadcast %cst_10 : f32 to vector<128x128xf32>
      %c0_11 = arith.constant 0 : index
      %c0_12 = arith.constant 0 : index
      %16 = vector.load %arg11[%c0_11, %c0_12] : memref<128x128xf32, #tpu.memory_space<vmem>>, vector<128x128xf32>
      tpu.vector_store %arg11[%c0_11, %c0_12], %15 {strides = array<i32>} : memref<128x128xf32, #tpu.memory_space<vmem>>, vector<128x128xf32>,
    } else {
    }
    %c0_1 = arith.constant 0 : index
    %c0_2 = arith.constant 0 : index
    %4 = vector.load %arg11[%c0_1, %c0_2] : memref<128x128xf32, #tpu.memory_space<vmem>>, vector<128x128xf32>
    %c0_3 = arith.constant 0 : index
    %c0_4 = arith.constant 0 : index
    %5 = vector.load %arg3[%c0_3, %c0_4] : memref<128x256xbf16, #tpu.memory_space<vmem>>, vector<128x256xbf16>
    %c256_i32 = arith.constant 256 : i32
    %6 = arith.muli %arg1, %c256_i32 : i32
    %7 = arith.index_cast %6 : i32 to index
    %c0_5 = arith.constant 0 : index
    %8 = vector.load %arg4[%7, %c0_5] : memref<256x128xbf16, #tpu.memory_space<vmem>>, vector<256x128xbf16>
    %cst = arith.constant dense<0.000000e+00> : vector<128x128xf32>
    %9 = tpu.matmul %5, %8, %cst {dimension_numbers = #tpu.dot_dimension_numbers<[1], [0], [0], [1], [0, 0, 1, 1], [], []>} : vector<128x256xbf16>, vector<256x128xbf16>, vector<128x128xf32> -> vector<128x128xf32>
    %10 = arith.addf %4, %9 : vector<128x128xf32>
    %c0_6 = arith.constant 0 : index
    %c0_7 = arith.constant 0 : index
    %11 = vector.load %arg11[%c0_6, %c0_7] : memref<128x128xf32, #tpu.memory_space<vmem>>, vector<128x128xf32>
    tpu.vector_store %arg11[%c0_6, %c0_7], %10 {strides = array<i32>} : memref<128x128xf32, #tpu.memory_space<vmem>>, vector<128x128xf32>,
    %c0_i32_8 = arith.constant 0 : i32
    %12 = arith.cmpi eq, %arg1, %c0_i32_8 : i32
    %13 = arith.extui %12 : i1 to i32
    %c0_i32_9 = arith.constant 0 : i32
    %14 = arith.cmpi ne, %13, %c0_i32_9 : i32
    scf.if %14 {
      %c128_i32 = arith.constant 128 : i32
      %15 = arith.muli %arg0, %c128_i32 : i32
      %16 = arith.index_cast %15 : i32 to index
      %c0_10 = arith.constant 0 : index
      %17 = vector.load %arg4[%16, %c0_10] : memref<256x128xbf16, #tpu.memory_space<vmem>>, vector<128x128xbf16>
      %c0_11 = arith.constant 0 : index
      %c0_12 = arith.constant 0 : index
      %18 = vector.load %arg5[%c0_11, %c0_12] : memref<128x128xbf16, #tpu.memory_space<vmem>>, vector<128x128xbf16>
      %cst_13 = arith.constant dense<0.000000e+00> : vector<128x128xf32>
      %19 = tpu.matmul %17, %18, %cst_13 {dimension_numbers = #tpu.dot_dimension_numbers<[1], [0], [0], [1], [0, 0, 1, 1], [], []>} : vector<128x128xbf16>, vector<128x128xbf16>, vector<128x128xf32> -> vector<128x128xf32>
      %c0_14 = arith.constant 0 : index
      %c0_15 = arith.constant 0 : index
      %20 = vector.load %arg11[%c0_14, %c0_15] : memref<128x128xf32, #tpu.memory_space<vmem>>, vector<128x128xf32>
      %21 = arith.truncf %20 : vector<128x128xf32> to vector<128x128xbf16>
      %c0_16 = arith.constant 0 : index
      %c0_17 = arith.constant 0 : index
      %22 = vector.load %arg6[%c0_16, %c0_17] : memref<128x128xbf16, #tpu.memory_space<vmem>>, vector<128x128xbf16>
      %cst_18 = arith.constant dense<0.000000e+00> : vector<128x128xf32>
      %23 = tpu.matmul %21, %22, %cst_18 {dimension_numbers = #tpu.dot_dimension_numbers<[1], [0], [0], [1], [0, 0, 1, 1], [], []>} : vector<128x128xbf16>, vector<128x128xbf16>, vector<128x128xf32> -> vector<128x128xf32>
      %24 = arith.addf %19, %23 : vector<128x128xf32>
      %25 = arith.truncf %24 : vector<128x128xf32> to vector<128x128xbf16>
      %c0_19 = arith.constant 0 : index
      %c0_20 = arith.constant 0 : index
      %26 = vector.load %arg9[%c0_19, %c0_20] : memref<128x128xbf16, #tpu.memory_space<vmem>>, vector<128x128xbf16>
      tpu.vector_store %arg9[%c0_19, %c0_20], %25 {strides = array<i32>} : memref<128x128xbf16, #tpu.memory_space<vmem>>, vector<128x128xbf16>,
      %27 = tpu.iota {dimensions = array<i32: 0>} : vector<128x1xi32>
      %c128_i32_21 = arith.constant 128 : i32
      %28 = arith.muli %arg0, %c128_i32_21 : i32
      %29 = vector.broadcast %28 : i32 to vector<128x1xi32>
      %30 = arith.addi %27, %29 : vector<128x1xi32>
      %31 = vector.broadcast %0 : i32 to vector<128x1xi32>
      %32 = arith.cmpi slt, %30, %31 : vector<128x1xi32>
      %cst_22 = arith.constant 0.000000e+00 : f32
      %33 = vector.shape_cast %32 : vector<128x1xi1> to vector<128x1xi1>
      %34 = vector.broadcast %33 : vector<128x1xi1> to vector<128x128xi1>
      %35 = vector.broadcast %cst_22 : f32 to vector<128x128xf32>
      %36 = arith.select %34, %24, %35 : vector<128x128xi1>, vector<128x128xf32>
      %cst_23 = arith.constant dense<0.000000e+00> : vector<128xf32>
      %37 = vector.multi_reduction <add>, %36, %cst_23 [0] : vector<128x128xf32> to vector<128xf32>
      %38 = vector.shape_cast %37 : vector<128xf32> to vector<1x128xf32>
      %39 = arith.mulf %36, %36 : vector<128x128xf32>
      %cst_24 = arith.constant dense<0.000000e+00> : vector<128xf32>
      %40 = vector.multi_reduction <add>, %39, %cst_24 [0] : vector<128x128xf32> to vector<128xf32>
      %41 = vector.shape_cast %40 : vector<128xf32> to vector<1x128xf32>
      %42 = tpu.concatenate %38, %41 in 0 : vector<1x128xf32>, vector<1x128xf32> -> vector<2x128xf32>
      %c0_25 = arith.constant 0 : index
      %c0_26 = arith.constant 0 : index
      %c0_27 = arith.constant 0 : index
      %43 = vector.load %arg10[%c0_25, %c0_26, %c0_27] : memref<1x2x128xf32, #tpu.memory_space<vmem>>, vector<1x2x128xf32>
      %44 = vector.shape_cast %43 : vector<1x2x128xf32> to vector<2x128xf32>
      %45 = vector.shape_cast %42 : vector<2x128xf32> to vector<1x2x128xf32>
      tpu.vector_store %arg10[%c0_25, %c0_26, %c0_27], %45 {strides = array<i32>} : memref<1x2x128xf32, #tpu.memory_space<vmem>>, vector<1x2x128xf32>,
    } else {
    }
    return
  }
  func.func @transform_0(%arg0: i32, %arg1: i32, %arg2: memref<1xi32, #tpu.memory_space<smem>>) -> (i32, i32) {
    %c0_i32 = arith.constant 0 : i32
    return %arg0, %arg1 : i32, i32
  }
  func.func @transform_1(%arg0: i32, %arg1: i32, %arg2: memref<1xi32, #tpu.memory_space<smem>>) -> (i32, i32) {
    %c0_i32 = arith.constant 0 : i32
    %c0_i32_0 = arith.constant 0 : i32
    %c0_i32_1 = arith.constant 0 : i32
    return %c0_i32, %c0_i32_0 : i32, i32
  }
  func.func @transform_2(%arg0: i32, %arg1: i32, %arg2: memref<1xi32, #tpu.memory_space<smem>>) -> (i32, i32) {
    %c0_i32 = arith.constant 0 : i32
    %c0_i32_0 = arith.constant 0 : i32
    %c0_i32_1 = arith.constant 0 : i32
    return %c0_i32, %c0_i32_0 : i32, i32
  }
  func.func @transform_3(%arg0: i32, %arg1: i32, %arg2: memref<1xi32, #tpu.memory_space<smem>>) -> (i32, i32) {
    %c0_i32 = arith.constant 0 : i32
    %c0_i32_0 = arith.constant 0 : i32
    %c0_i32_1 = arith.constant 0 : i32
    return %c0_i32, %c0_i32_0 : i32, i32
  }
  func.func @transform_4(%arg0: i32, %arg1: i32, %arg2: memref<1xi32, #tpu.memory_space<smem>>) -> (i32, i32) {
    %c0_i32 = arith.constant 0 : i32
    %c0_i32_0 = arith.constant 0 : i32
    %c0_i32_1 = arith.constant 0 : i32
    return %c0_i32, %c0_i32_0 : i32, i32
  }
  func.func @transform_5(%arg0: i32, %arg1: i32, %arg2: memref<1xi32, #tpu.memory_space<smem>>) -> (i32, i32) {
    %c0_i32 = arith.constant 0 : i32
    %c0_i32_0 = arith.constant 0 : i32
    %c0_i32_1 = arith.constant 0 : i32
    return %c0_i32, %c0_i32_0 : i32, i32
  }
  func.func @transform_6(%arg0: i32, %arg1: i32, %arg2: memref<1xi32, #tpu.memory_space<smem>>) -> (i32, i32) {
    %c0_i32 = arith.constant 0 : i32
    %c0_i32_0 = arith.constant 0 : i32
    return %arg0, %c0_i32 : i32, i32
  }
  func.func @transform_7(%arg0: i32, %arg1: i32, %arg2: memref<1xi32, #tpu.memory_space<smem>>) -> (i32, i32, i32) {
    %c0_i32 = arith.constant 0 : i32
    %c0_i32_0 = arith.constant 0 : i32
    %c0_i32_1 = arith.constant 0 : i32
    return %arg0, %c0_i32, %c0_i32_0 : i32, i32, i32
  }
}

</mosaic_0001>

<bundles_post_ra>
// kernel: tpu_custom_call.1
= control target key start
LH: loop header
LB: loop body
LE: loop exit
PB: predicated region body
PF: predicated region fallthrough
CT: control target
= control target key end

     0   :  { %s2847_s0 = inlined_call_operand.<no memory space> [shape: s32[1], index: 0, kind: input, shape index: {}]   ;;  %s2848_s1 = inlined_call_operand.hbm [shape: bf16[256,256], index: 1, kind: input, shape index: {}]   ;;  %s2849_s2 = inlined_call_operand.hbm [shape: bf16[256,128], index: 2, kind: input, shape index: {}]   ;;  %s2850_s3 = inlined_call_operand.hbm [shape: bf16[128,128], index: 3, kind: input, shape index: {}]   ;;  %s2851_s4 = inlined_call_operand.hbm [shape: bf16[128,128], index: 4, kind: input, shape index: {}]   ;;  %s2852_s5 = inlined_call_operand.vmem [shape: f32[1,128], index: 5, kind: input, shape index: {}]   ;;  %s2853_s6 = inlined_call_operand.vmem [shape: f32[1,128], index: 6, kind: input, shape index: {}]   ;;  %s2854_s7 = inlined_call_operand.hbm [shape: bf16[256,128], index: 7, kind: output, shape index: {0}]   ;;  %s2855_s8 = inlined_call_operand.hbm [shape: f32[2,2,128], index: 8, kind: output, shape index: {1}]  }
   0x1   :  { %14 = sst [smem:[#allocation4]] %s2847_s0 }
   0x2   :  { %15 = vsyncpa [#allocation6], 0 }
   0x3   :  { %17 = vsyncpa [#allocation6 + $0x1], 0 }
   0x4   :  { %18 = vsyncpa [#allocation9], 0 }
   0x5   :  { %19 = vsyncpa [#allocation12], 0 }
   0x6   :  { %20 = vsyncpa [#allocation7], 0 }
   0x7   :  { %22 = vsyncpa [#allocation7 + $0x1], 0 }
   0x8   :  { %23 = vsyncpa [#allocation15], 0 }
   0x9   :  { %25 = vsyncpa [#allocation15 + $0x1], 0  ;;  %s2416_s5 = smov 0   ;;  %s2418_s6 = smov 0  }
   0xa   :  { %s2420_s29 = smov 0   ;;  %s2422_s30 = smov 0  }
   0xb   :  { %s2424_s9 = smov 0   ;;  %s2426_s10 = smov 0  }
   0xc LB: > { %2862 = sst [smem:[#allocation21_spill]] %s2334_s5  ;;  %s1609_s0 = sadd.s32 4294967295, %s2354_s10   ;;  %s2354_s10 = sphi %s2426_s10, %s31_s10   ;;  %s2350_s9 = sphi %s2424_s9, %s2885_s9   ;;  %s2346_s30 = sphi %s2422_s30, %s2884_s30   ;;  %s2342_s29 = sphi %s2420_s29, %s2883_s29   ;;  %s2338_s6 = sphi %s2418_s6, %s2882_s6   ;;  %s2334_s5 = sphi %s2416_s5, %s2881_s5  }
   0xd   : > { %s1610_s11 = sadd.s32 4294967294, %s2354_s10   ;;  %p65_p0 = scmp.ne.s32.totalorder %s2338_s6, %s2334_s5 }
   0xe   : > { %p2450_p1 = scmp.eq.s32.totalorder %s1609_s0, 0  ;;  %p2454_p2 = scmp.eq.s32.totalorder %s1609_s0, 1 }
   0xf   : > { %p200_p3 = scmp.eq.s32.totalorder %s1610_s11, 1  ;;  %p1611_p5 = scmp.ge.s32.totalorder %s2354_s10, 1 }
  0x10   : > { %s2863_s12 = scalar_select %p2450_p1, 1, 0 }
  0x11   : > { %s2864_s13 = scalar_select %p2454_p2, 1, 0 }
  0x12   : > { %p2460_p4 = por %p2450_p1, %p65_p0  ;;  %p2465_p6 = por %p200_p3, %p65_p0 }
  0x13   : > { %p233_p7 = scmp.lt.s32.totalorder %s2354_s10, 3  ;;  %s2356_s17 = smov [#allocation8]  }
  0x14   : > { %s2865_s14 = scalar_select %p2460_p4, 1, 0 }
  0x15   : > { %s2866_s15 = scalar_select %p2465_p6, 1, 0 }
  0x16   : > { %p2470_p8 = pnand %p1611_p5, %p233_p7  ;;  %s245_s18 = sshll.u32 %s2356_s17, 4  ;;  %s2474_s18 = int_to_ptr.vmem [resolvable:$true] %s245_s18 }
  0x17   : > { %2867 = sst [smem:[#allocation22_spill]] %s2866_s15  ;;  %s2357_s20 = smov [#allocation10]  }
  0x18   : > { %s2868_s16 = scalar_select %p2470_p8, 1, 0 }
  0x19   : > { %p1968_p9 = pneg %p2470_p8  ;;  %s258_s21 = sshll.u32 %s2357_s20, 4  ;;  %s2485_s21 = int_to_ptr.vmem [resolvable:$true] %s258_s21 }
  0x1a   : > { %s2358_s22 = smov [#allocation11]   ;;  %s2118_s26 = scalar_lea.hbm %s2849_s2, 2048 }
  0x1b   : > { %p2481_p11 = pnand %p1968_p9, %p2450_p1  ;;  %s2487_s23 = sshll.u32 %s2358_s22, 4  ;;  %s272_s23 = int_to_ptr.vmem [resolvable:$true] %s2487_s23 }
  0x1c   : > { %p2119_p12 = scmp.ne.s32.totalorder %s2849_s2, %s2118_s26  ;;  %p2125_p5 = scmp.lt.u32.totalorder %s2118_s26, %s2849_s2 }
  0x1d   : > { %p2497_p13 = pneg %p2481_p11 }
  0x1f   : > { %p2121_p0 = pnand %p2497_p13, %p2119_p12 }
  0x21   : > { %p2122_p3 = pneg %p2121_p0 }
  0x23   : > { %p2127_p7 = pnand %p2125_p5, %p2122_p3 }
  0x25   : > { %2130 = shalt.err (!%p2127_p7)
}
  0x26   : > { %s2131_s20 = scalar_lea.vmem %s2474_s18, 2048  ;;  %p2139_p1 = scmp.lt.s32.totalorder %s2474_s18, %s2474_s18 }
  0x27   : > { %p2132_p9 = scmp.ne.s32.totalorder %s2474_s18, %s2131_s20  ;;  %p2140_p4 = scmp.lt.s32.totalorder %s2131_s20, %s2131_s20 }
  0x29   : > { %p2134_p10 = pnand %p2132_p9, %p2497_p13  ;;  %p2141_p12 = por %p2140_p4, %p2139_p1 }
  0x2b   : > { %p2135_p6 = pneg %p2134_p10 }
  0x2d   : > { %p2142_p0 = pnand %p2141_p12, %p2135_p6 }
  0x2f   : > { %2145 = shalt.err (!%p2142_p0)
}
  0x30   : > { %s2359_s22 = smov 64   ;;  %s2360_s24 = smov 4  }
  0x31   : > { %1971 = dma.hbm_to_vmem [thread:$0]  (!%p2481_p11), %s2849_s2, 2048, %s2474_s18, [#allocation9], %s2359_s22, %s2359_s22, %s2360_s24  }
  0x32   : > { %s2146_s11 = scalar_lea.hbm %s2850_s3, 1024 }
  0x33   : > { %p2147_p1 = scmp.ne.s32.totalorder %s2850_s3, %s2146_s11  ;;  %p2153_p10 = scmp.lt.u32.totalorder %s2146_s11, %s2850_s3 }
  0x35   : > { %p2149_p4 = pnand %p2147_p1, %p2497_p13 }
  0x37   : > { %p2150_p6 = pneg %p2149_p4 }
  0x39   : > { %p2155_p3 = pnand %p2153_p10, %p2150_p6 }
  0x3b   : > { %2158 = shalt.err (!%p2155_p3)
}
  0x3c   : > { %s2159_s18 = scalar_lea.vmem %s2485_s21, 1024  ;;  %p2167_p12 = scmp.lt.s32.totalorder %s2485_s21, %s2485_s21 }
  0x3d   : > { %p2160_p5 = scmp.ne.s32.totalorder %s2485_s21, %s2159_s18  ;;  %p2168_p0 = scmp.lt.s32.totalorder %s2159_s18, %s2159_s18 }
  0x3f   : > { %p2162_p7 = pnand %p2160_p5, %p2497_p13  ;;  %p2169_p1 = por %p2168_p0, %p2167_p12 }
  0x41   : > { %p2163_p9 = pneg %p2162_p7 }
  0x43   : > { %p2170_p4 = pnand %p2169_p1, %p2163_p9 }
  0x45   : > { %2173 = shalt.err (!%p2170_p4)
}
  0x46   : > { %1974 = dma.hbm_to_vmem [thread:$0]  (!%p2481_p11), %s2850_s3, 1024, %s2485_s21, [#allocation9], %s2359_s22, %s2359_s22, %s2360_s24  }
  0x47   : > { %s2174_s27 = scalar_lea.hbm %s2851_s4, 1024 }
  0x48   : > { %p2175_p6 = scmp.ne.s32.totalorder %s2851_s4, %s2174_s27  ;;  %p2181_p5 = scmp.lt.u32.totalorder %s2174_s27, %s2851_s4 }
  0x4a   : > { %p2177_p10 = pnand %p2175_p6, %p2497_p13 }
  0x4c   : > { %p2178_p3 = pneg %p2177_p10 }
  0x4e   : > { %p2183_p7 = pnand %p2181_p5, %p2178_p3 }
  0x50   : > { %2186 = shalt.err (!%p2183_p7)
}
  0x51   : > { %s2187_s18 = scalar_lea.vmem %s272_s23, 1024  ;;  %p2195_p1 = scmp.lt.s32.totalorder %s272_s23, %s272_s23 }
  0x52   : > { %p2188_p9 = scmp.ne.s32.totalorder %s272_s23, %s2187_s18  ;;  %p2196_p4 = scmp.lt.s32.totalorder %s2187_s18, %s2187_s18 }
  0x54   : > { %p2190_p12 = pnand %p2188_p9, %p2497_p13  ;;  %p2197_p8 = por %p2196_p4, %p2195_p1 }
  0x56   : > { %p2191_p0 = pneg %p2190_p12 }
  0x58   : > { %p2198_p2 = pnand %p2197_p8, %p2191_p0 }
  0x5a   : > { %2201 = shalt.err (!%p2198_p2)
}
  0x5b   : > { %1977 = dma.hbm_to_vmem [thread:$0]  (!%p2481_p11), %s2851_s4, 1024, %s272_s23, [#allocation12], %s2359_s22, %s2359_s22, %s2360_s24  }
  0x5c   : > { %s52_s0 = sadd.s32 1, %s2342_s29  ;;  %s43_s19 = sadd.s32 1, %s2350_s9 }
  0x5d   : > { %p59_p2 = scmp.ne.s32.totalorder %s2342_s29, %s2338_s6  ;;  %p45_p8 = scmp.ge.s32.totalorder %s43_s19, 2 }
  0x5e   : > { %p60_p13 = scmp.eq.s32.totalorder %s2354_s10, 0  ;;  %p2871_p6 = scmp.ne.s32.totalorder %s2864_s13, 0 }
  0x5f   : > { %p1992_p3 = scmp.lt.s32.totalorder %s2354_s10, 2  ;;  %s2887_s19 = smov (%p45_p8, %s43_s19), 0 }
  0x60   : > { %p2576_p10 = por %p2871_p6, %p59_p2  ;;  %p61_p5 = por %p60_p13, %p59_p2 }
  0x61   : > { %s291_s25 = sand.u32 1, %s2342_s29   ;;  %s47_s26 = ssub.s32 %s2350_s9, %s2887_s19 }
  0x62   : > { %p50_p7 = scmp.eq.s32.totalorder %s47_s26, 0  ;;  %s1616_s23 = sshll.u32 %s291_s25, 7 }
  0x63   : > { %s1709_s22 = sshll.u32 %s2350_s9, 11  ;;  %s295_s11 = scalar_lea.vmem [#allocation5], %s1616_s23 }
  0x64   : > { %s2588_s24 = scalar_select %p50_p7, %s2342_s29, %s52_s0  }
  0x65   : > { %s2593_s13 = scalar_lea.hbm %s2848_s1, %s1709_s22  ;;  %s305_s17 = sshll.u32 %s295_s11, 4  ;;  %s2595_s17 = int_to_ptr.vmem [resolvable:$true] %s305_s17 }
  0x66   : > { %p2599_p11 = pnand %p1992_p3, %p61_p5  ;;  %s2603_s18 = scalar_lea.sflag [#allocation6], %s291_s25 }
  0x67   : > { %s2202_s21 = scalar_lea.hbm %s2593_s13, 2048  ;;  %s2207_s26 = scalar_lea.hbm %s2848_s1, 4096 }
  0x68   : > { %p2203_p9 = scmp.ne.s32.totalorder %s2593_s13, %s2202_s21  ;;  %p2204_p12 = pneg %p2599_p11 }
  0x69   : > { %p2208_p4 = scmp.lt.u32.totalorder %s2593_s13, %s2848_s1  ;;  %p2209_p2 = scmp.lt.u32.totalorder %s2207_s26, %s2202_s21 }
  0x6a   : > { %p2205_p0 = pnand %p2204_p12, %p2203_p9  ;;  %p2211_p13 = scmp.lt.u32.totalorder %s2202_s21, %s2593_s13 }
  0x6b   : > { %p2210_p8 = por %p2209_p2, %p2208_p4 }
  0x6c   : > { %p2206_p1 = pneg %p2205_p0 }
  0x6d   : > { %p2212_p6 = por %p2211_p13, %p2210_p8 }
  0x6f   : > { %p2213_p3 = pnand %p2212_p6, %p2206_p1 }
  0x71   : > { %2216 = shalt.err (!%p2213_p3)
}
  0x72   : > { %s2217_s25 = scalar_lea.vmem %s2595_s17, 2048  ;;  %s2361_s27 = smov [#allocation5]  }
  0x73   : > { %p2218_p5 = scmp.ne.s32.totalorder %s2595_s17, %s2217_s25  ;;  %s2222_s28 = sshll.u32 %s2361_s27, 4  ;;  %s2223_s28 = int_to_ptr.vmem [resolvable:$false] %s2222_s28 }
  0x74   : > { %s2224_s11 = scalar_lea.vmem %s2223_s28, 4096  ;;  %p2225_p0 = scmp.lt.s32.totalorder %s2595_s17, %s2223_s28 }
  0x75   : > { %p2220_p7 = pnand %p2218_p5, %p2204_p12  ;;  %p2226_p4 = scmp.lt.s32.totalorder %s2224_s11, %s2217_s25 }
  0x77   : > { %p2221_p9 = pneg %p2220_p7  ;;  %p2227_p2 = por %p2226_p4, %p2225_p0 }
  0x79   : > { %p2228_p8 = pnand %p2227_p2, %p2221_p9 }
  0x7b   : > { %2231 = shalt.err (!%p2228_p8)
}
  0x7c   : > { %s2362_s21 = smov 128   ;;  %s2363_s5 = smov 8  }
  0x7d   : > { %1981 = dma.hbm_to_vmem [thread:$0]  (!%p2599_p11), %s2593_s13, 2048, %s2595_s17, %s2603_s18, %s2362_s21, %s2362_s21, %s2363_s5  }
  0x7e   : > { %p2874_p12 = scmp.ne.s32.totalorder %s2868_s16, 0 }
  0x7f   : > { %s2634_s0 = sand.u32 (!%p2874_p12), 1, %s2338_s6   ;;  %p2875_p1 = scmp.ne.s32.totalorder (!%p2874_p12), %s2865_s14, 0 }
  0x80   : > { %317 = sbr.rel (%p2874_p12) target bundleno = 743 (0x2e7), region = 44  ;;  %s1621_s26 = sshll.u32 (!%p2874_p12), %s2634_s0, 7 }
  0x81   : > { %s320_s23 = scalar_lea.sflag (!%p2874_p12), [#allocation6], %s2634_s0  ;;  %s2638_s22 = scalar_lea.vmem (!%p2874_p12), [#allocation5], %s1621_s26 }
  0x87   : > { %2313 = dma.done.wait (%p2875_p1), %s320_s23, 2048  }
  0x88   : > { %2315 = vsyncadd (%p2875_p1), %s320_s23, 4294965248  ;;  %p2876_p11 = scmp.ne.s32.totalorder %s2863_s12, 0 }
  0x8a   : > { %2317 = dma.done.wait (%p2876_p11), [#allocation9], 3072  }
  0x8b   : > { %2319 = vsyncadd (%p2876_p11), [#allocation9], 4294964224 }
  0x8c   : > { %2321 = dma.done.wait (%p2876_p11), [#allocation12], 1024  }
  0x8d   : > { %2323 = vsyncadd (%p2876_p11), [#allocation12], 4294966272  ;;  %v2054_v0 = vld [vmem:[#allocation8 + $0x40] sm:$0xff]   ;;  %v2056_v2 = vld [vmem:[#allocation8 + $0x48] sm:$0xff]   ;;  %s1659_s12 = sshll.u32 %s2346_s30, 7  ;;  %s375_s17 = sld [smem:[#allocation4]] }
  0x8e   : > { %v2055_v1 = vld [vmem:[#allocation8] sm:$0xff]   ;;  %1774 = vmatprep.subr.bf16.mxu0 %v2054_v0  ;;  %v2057_v3 = vld [vmem:[#allocation8 + $0x8] sm:$0xff]   ;;  %v2058_v4 = vld [vmem:[#allocation8 + $0x50] sm:$0xff]   ;;  %s774_s14 = sshra.s32 %s1659_s12, 3  ;;  %s1625_s20 = sshll.u32 %s2634_s0, 6 }
  0x8f   : > { %1775 = vmatpush3.bf16.msra.mxu0 %v2055_v1  ;;  %v2059_v5 = vld [vmem:[#allocation8 + $0x10] sm:$0xff]   ;;  %v2060_v6 = vld [vmem:[#allocation8 + $0x58] sm:$0xff]   ;;  %v2062_v8 = vld [vmem:[#allocation8 + $0x60] sm:$0xff]   ;;  %s1660_s16 = sshll.u32 %s774_s14, 2  ;;  %s2709_s18 = scalar_lea.vmem [#allocation13], %s1625_s20 }
  0x90   : > { %1776 = vmatprep.subr.bf16.mxu0 %v2056_v2  ;;  %v2061_v7 = vld [vmem:[#allocation8 + $0x18] sm:$0xff]   ;;  %v2063_v9 = vld [vmem:[#allocation8 + $0x20] sm:$0xff]   ;;  %v2064_v10 = vld [vmem:[#allocation8 + $0x68] sm:$0xff]   ;;  %s2671_s13 = scalar_lea.vmem [#allocation8], %s1660_s16  ;;  %s1447_s25 = sshll.u32 %s2709_s18, 4  ;;  %s2757_s25 = int_to_ptr.vmem [resolvable:$true] %s1447_s25 }
  0x91   : > { %v2072_v11 = vld [vmem:[%s2638_s22 + $0x4] ss:$8 sps:$4 sm:$0xff]   ;;  %v2066_v13 = vld [vmem:[#allocation8 + $0x70] sm:$0xff]   ;;  %v2068_v15 = vld [vmem:[#allocation8 + $0x78] sm:$0xff]   ;;  %s1726_s27 = sshll.u32 %s2346_s30, 10  ;;  %s1429_s5 = scalar_lea.sflag [#allocation7], %s2634_s0 }
  0x92   : > { %v2065_v12 = vld [vmem:[#allocation8 + $0x28] sm:$0xff]   ;;  %673 = vmatprep.mubr.bf16.mxu0 %v2072_v11  ;;  %v2067_v14 = vld [vmem:[#allocation8 + $0x30] sm:$0xff]   ;;  %v2069_v16 = vld [vmem:[#allocation8 + $0x38] sm:$0xff]   ;;  %s2763_s21 = scalar_lea.hbm %s2854_s7, %s1726_s27  ;;  %s2232_s26 = scalar_lea.vmem %s2757_s25, 1024 }
  0x93   : > { %1777 = vmatpush3.bf16.msra.mxu0 %v2057_v3  ;;  %v2094_v17 = vld [vmem:[#allocation11] sm:$0xff]   ;;  %v2095_v19 = vld [vmem:[#allocation11 + $0x8] sm:$0xff]   ;;  %v2073_v20 = vld [vmem:[%s2638_s22 + $0x14] ss:$8 sps:$4 sm:$0xff]   ;;  %p2233_p13 = scmp.ne.s32.totalorder %s2757_s25, %s2232_s26  ;;  %s2364_s23 = smov [#allocation13]  }
  0x94   : > { %1778 = vmatprep.subr.bf16.mxu0 %v2058_v4  ;;  %v2070_v18 = vld [vmem:[%s2638_s22] ss:$8 sps:$4 sm:$0xff]   ;;  %1870 = vmatprep.subr.bf16.mxu1 %v2094_v17  ;;  %v2096_v21 = vld [vmem:[#allocation11 + $0x10] sm:$0xff]   ;;  %v2097_v22 = vld [vmem:[#allocation11 + $0x18] sm:$0xff]  }
  0x95   : > { %1871 = vmatpush3.bf16.msra.mxu1 %v2094_v17  ;;  %v2075_v23 = vld [vmem:[%s2638_s22 + $0x10] ss:$8 sps:$4 sm:$0xff]   ;;  %v2076_v24 = vld [vmem:[%s2638_s22 + $0x24] ss:$8 sps:$4 sm:$0xff]   ;;  %v2078_v25 = vld [vmem:[%s2638_s22 + $0x20] ss:$8 sps:$4 sm:$0xff]   ;;  %p2234_p6 = pnand %p2233_p13, %p2576_p10 }
  0x96   : > { %1872 = vmatprep.subr.bf16.mxu1 %v2095_v19  ;;  %v2079_v26 = vld [vmem:[%s2638_s22 + $0x34] ss:$8 sps:$4 sm:$0xff]   ;;  %v2081_v27 = vld [vmem:[%s2638_s22 + $0x30] ss:$8 sps:$4 sm:$0xff]   ;;  %v2082_v28 = vld [vmem:[%s2638_s22 + $0x44] ss:$8 sps:$4 sm:$0xff]  }
  0x97   : > { %1779 = vmatpush3.bf16.msra.mxu0 %v2059_v5  ;;  %v2084_v29 = vld [vmem:[%s2638_s22 + $0x40] ss:$8 sps:$4 sm:$0xff]   ;;  %v2085_v30 = vld [vmem:[%s2638_s22 + $0x54] ss:$8 sps:$4 sm:$0xff]   ;;  %v2087_v31 = vld [vmem:[%s2638_s22 + $0x50] ss:$8 sps:$4 sm:$0xff]   ;;  %p2235_p3 = pneg %p2234_p6 }
  0x98   : > { %1780 = vmatprep.subr.bf16.mxu0 %v2060_v6  ;;  %v2088_v32 = vld [vmem:[%s2638_s22 + $0x64] ss:$8 sps:$4 sm:$0xff]   ;;  %v2090_v33 = vld [vmem:[%s2638_s22 + $0x60] ss:$8 sps:$4 sm:$0xff]   ;;  %v2091_v34 = vld [vmem:[%s2638_s22 + $0x74] ss:$8 sps:$4 sm:$0xff]  }
  0x99   : > { %1873 = vmatpush3.bf16.msra.mxu1 %v2095_v19  ;;  %v2093_v35 = vld [vmem:[%s2638_s22 + $0x70] ss:$8 sps:$4 sm:$0xff]   ;;  %v2098_v36 = vld [vmem:[#allocation11 + $0x20] sm:$0xff]   ;;  %v2099_v37 = vld [vmem:[#allocation11 + $0x28] sm:$0xff]   ;;  %s2236_s22 = sshll.u32 %s2364_s23, 4  ;;  %s2237_s22 = int_to_ptr.vmem [resolvable:$false] %s2236_s22 }
  0x9a   : > { %1874 = vmatprep.subr.bf16.mxu1 %v2096_v21  ;;  %v2100_v38 = vld [vmem:[#allocation11 + $0x30] sm:$0xff]   ;;  %v2101_v39 = vld [vmem:[#allocation11 + $0x38] sm:$0xff]   ;;  %v2102_v40 = vld [vmem:[#allocation10] sm:$0xff]   ;;  %p2239_p5 = scmp.lt.s32.totalorder %s2757_s25, %s2237_s22 }
  0x9b   : > { %1781 = vmatpush3.bf16.msra.mxu0 %v2061_v7  ;;  %v2103_v55 = vld [vmem:[#allocation10 + $0x8] sm:$0xff]   ;;  %v2104_v60 = vld [vmem:[#allocation10 + $0x10] sm:$0xff]   ;;  %v2105_v0 = vld [vmem:[#allocation10 + $0x18] sm:$0xff]  }
  0x9c   : > { %1782 = vmatprep.subr.bf16.mxu0 %v2062_v8  ;;  %v2106_v5 = vld [vmem:[#allocation10 + $0x20] sm:$0xff]  }
  0x9d   : > { %1875 = vmatpush3.bf16.msra.mxu1 %v2096_v21 }
  0x9e   : > { %1876 = vmatprep.subr.bf16.mxu1 %v2097_v22 }
  0x9f   : > { %1783 = vmatpush3.bf16.msra.mxu0 %v2063_v9  ;;  %v2107_v9 = vld [vmem:[#allocation10 + $0x28] sm:$0xff]  }
  0xa0   : > { %1784 = vmatprep.subr.bf16.mxu0 %v2064_v10 }
  0xa1   : > { %1877 = vmatpush3.bf16.msra.mxu1 %v2097_v22 }
  0xa2   : > { %1878 = vmatprep.subr.bf16.mxu1 %v2098_v36 }
  0xa3   : > { %1785 = vmatpush3.bf16.msra.mxu0 %v2065_v12 }
  0xa4   : > { %1786 = vmatprep.subr.bf16.mxu0 %v2066_v13 }
  0xa5   : > { %1879 = vmatpush3.bf16.msra.mxu1 %v2098_v36 }
  0xa6   : > { %1880 = vmatprep.subr.bf16.mxu1 %v2099_v37 }
  0xa7   : > { %1787 = vmatpush3.bf16.msra.mxu0 %v2067_v14  ;;  %v2108_v14 = vld [vmem:[#allocation10 + $0x30] sm:$0xff]  }
  0xa8   : > { %1788 = vmatprep.subr.bf16.mxu0 %v2068_v15 }
  0xa9   : > { %1881 = vmatpush3.bf16.msra.mxu1 %v2099_v37 }
  0xaa   : > { %1882 = vmatprep.subr.bf16.mxu1 %v2100_v38 }
  0xab   : > { %1789 = vmatpush3.bf16.msra.mxu0 %v2069_v16 }
  0xad   : > { %1883 = vmatpush3.bf16.msra.mxu1 %v2100_v38 }
  0xae   : > { %674 = vmatmul.mubr.bf16.vlgmr.msra.gmra.mrb[0].mxu0 %v2070_v18  ;;  %1884 = vmatprep.subr.bf16.mxu1 %v2101_v39  ;;  %v2109_v18 = vld [vmem:[#allocation10 + $0x38] sm:$0xff]  }
  0xaf   : > { %681 = vmatprep.mubr.bf16.mxu0 %v2073_v20 }
  0xb1   : > { %1885 = vmatpush3.bf16.msra.mxu1 %v2101_v39  ;;  %v2110_v39 = vld [vmem:[%s2671_s13] sm:$0xff]  }
  0xb2   : > { %1902 = vmatprep.subr.bf16.mxu1 %v2102_v40 }
  0xb6   : > { %682 = vmatmul.mubr.bf16.gmra.mrb[4].mxu0 %v2075_v23 }
  0xb7   : > { %689 = vmatprep.mubr.bf16.mxu0 %v2076_v24 }
  0xbe   : > { %690 = vmatmul.mubr.bf16.gmra.mrb[8].mxu0 %v2078_v25 }
  0xbf   : > { %697 = vmatprep.mubr.bf16.mxu0 %v2079_v26 }
  0xc6   : > { %698 = vmatmul.mubr.bf16.gmra.mrb[12].mxu0 %v2081_v27 }
  0xc7   : > { %705 = vmatprep.mubr.bf16.mxu0 %v2082_v28 }
  0xce   : > { %706 = vmatmul.mubr.bf16.gmra.mrb[16].mxu0 %v2084_v29 }
  0xcf   : > { %713 = vmatprep.mubr.bf16.mxu0 %v2085_v30 }
  0xd6   : > { %714 = vmatmul.mubr.bf16.gmra.mrb[20].mxu0 %v2087_v31 }
  0xd7   : > { %721 = vmatprep.mubr.bf16.mxu0 %v2088_v32 }
  0xde   : > { %722 = vmatmul.mubr.bf16.gmra.mrb[24].mxu0 %v2090_v33 }
  0xdf   : > { %729 = vmatprep.mubr.bf16.mxu0 %v2091_v34 }
  0xe6   : > { %730 = vmatmul.mubr.bf16.gmra.mrb[28].mxu0 %v2093_v35 }
 0x181   : > { %v1790_v41 = vpop.f32.mrb[0].mxu0 }
 0x182   : > { %v1791_v42 = vpop.f32.mrb[1].mxu0 }
 0x183   : > { %v1792_v43 = vadd.f32 %v1791_v42, %v1790_v41  ;;  %v1793_v44 = vpop.f32.mrb[2].mxu0  ;;  %v2111_v41 = vld [vmem:[%s2671_s13 + $0x8] sm:$0xff]   ;;  %v2112_v42 = vld [vmem:[%s2671_s13 + $0x10] sm:$0xff]  }
 0x184   : > { %v1794_v45 = vpop.f32.mrb[3].mxu0 }
 0x185   : > { %v1795_v46 = vadd.f32 %v1794_v45, %v1793_v44  ;;  %v2114_v44 = vld [vmem:[%s2671_s13 + $0x20] sm:$0xff]   ;;  %v2115_v45 = vld [vmem:[%s2671_s13 + $0x28] sm:$0xff]  }
 0x187   : > { %v826_v47 = vpack.c.bf16 %v1795_v46, %v1792_v43  ;;  %v2113_v43 = vld [vmem:[%s2671_s13 + $0x18] sm:$0xff]   ;;  %v2116_v46 = vld [vmem:[%s2671_s13 + $0x30] sm:$0xff]  }
 0x189   : > { %v1796_v48 = vpop.f32.mrb[4].mxu0  ;;  %1886 = vmatprep.mubr.bf16.mxu1 %v826_v47  ;;  %v2117_v47 = vld [vmem:[%s2671_s13 + $0x38] sm:$0xff]  }
 0x18a   : > { %v1797_v49 = vpop.f32.mrb[5].mxu0 }
 0x18b   : > { %v1798_v50 = vadd.f32 %v1797_v49, %v1796_v48  ;;  %v1799_v51 = vpop.f32.mrb[6].mxu0  ;;  %v1268_v48 = vlaneseq }
 0x18c   : > { %v1800_v52 = vpop.f32.mrb[7].mxu0 }
 0x18d   : > { %v1801_v53 = vadd.f32 %v1800_v52, %v1799_v51  ;;  %v2681_v49 = vshrl.u32 %v1268_v48, 7 }
 0x18f   : > { %v827_v54 = vpack.c.bf16 %v1801_v53, %v1798_v50  ;;  %v2685_v50 = vstv %s1659_s12  ;;  %v1271_v51 = vadd.s32 16, %v2681_v49  ;;  %v1270_v52 = vadd.s32 8, %v2681_v49  ;;  %s2238_s12 = scalar_lea.vmem %s2237_s22, 2048 }
 0x190   : > { %v1286_v53 = vadd.s32 %v2685_v50, %v2681_v49  ;;  %p2240_p7 = scmp.lt.s32.totalorder %s2238_s12, %s2232_s26 }
 0x191   : > { %v1802_v56 = vpop.f32.mrb[8].mxu0  ;;  %1887 = vmatmul.mubr.bf16.vlgmr.msra.gmra.mrb[0].mxu1 %v827_v54  ;;  %v1272_v54 = vadd.s32 24, %v2681_v49 }
 0x192   : > { %v1803_v57 = vpop.f32.mrb[9].mxu0  ;;  %1903 = vmatpush3.bf16.msra.mxu1 %v2102_v40  ;;  %p2241_p9 = por %p2240_p7, %p2239_p5 }
 0x193   : > { %v1804_v58 = vadd.f32 %v1803_v57, %v1802_v56  ;;  %v1805_v59 = vpop.f32.mrb[10].mxu0  ;;  %1904 = vmatprep.subr.bf16.mxu1 %v2103_v55  ;;  %v1288_v56 = vadd.s32 %v2685_v50, %v1271_v51  ;;  %v1287_v57 = vadd.s32 %v2685_v50, %v1270_v52 }
 0x194   : > { %v1806_v61 = vpop.f32.mrb[11].mxu0  ;;  %p2242_p0 = pnand %p2241_p9, %p2235_p3 }
 0x195   : > { %v1807_v62 = vadd.f32 %v1806_v61, %v1805_v59  ;;  %v1275_v59 = vadd.s32 48, %v2681_v49 }
 0x196   : > { %1905 = vmatpush3.bf16.msra.mxu1 %v2103_v55  ;;  %v2692_v55 = vstv %s375_s17 }
 0x197   : > { %v828_v63 = vpack.c.bf16 %v1807_v62, %v1804_v58  ;;  %1906 = vmatprep.subr.bf16.mxu1 %v2104_v60  ;;  %vm1303_vm0 = vcmp.lt.s32.totalorder %v1286_v53, %v2692_v55  ;;  %v1289_v58 = vadd.s32 %v2685_v50, %v1272_v54  ;;  %v1276_v62 = vadd.s32 56, %v2681_v49 }
 0x198   : > { %vm1305_vm1 = vcmp.lt.s32.totalorder %v1288_v56, %v2692_v55  ;;  %vm1304_vm2 = vcmp.lt.s32.totalorder %v1287_v57, %v2692_v55  ;;  %v1283_v53 = vadd.s32 112, %v2681_v49 }
 0x199   : > { %v1808_v1 = vpop.f32.mrb[12].mxu0  ;;  %1890 = vmatprep.mubr.bf16.mxu1 %v828_v63  ;;  %vm1306_vm3 = vcmp.lt.s32.totalorder %v1289_v58, %v2692_v55 }
 0x19a   : > { %v1809_v2 = vpop.f32.mrb[13].mxu0  ;;  %1907 = vmatpush3.bf16.msra.mxu1 %v2104_v60  ;;  %v1273_v60 = vadd.s32 32, %v2681_v49 }
 0x19b   : > { %v1810_v3 = vadd.f32 %v1809_v2, %v1808_v1  ;;  %v1811_v4 = vpop.f32.mrb[14].mxu0  ;;  %1908 = vmatprep.subr.bf16.mxu1 %v2105_v0 }
 0x19c   : > { %v1812_v6 = vpop.f32.mrb[15].mxu0 }
 0x19d   : > { %v1813_v7 = vadd.f32 %v1812_v6, %v1811_v4  ;;  %v1290_v6 = vadd.s32 %v2685_v50, %v1273_v60 }
 0x19e   : > { %1909 = vmatpush3.bf16.msra.mxu1 %v2105_v0  ;;  %v1274_v0 = vadd.s32 40, %v2681_v49 }
 0x19f   : > { %v829_v8 = vpack.c.bf16 %v1813_v7, %v1810_v3  ;;  %1910 = vmatprep.subr.bf16.mxu1 %v2106_v5  ;;  %vm1307_vm4 = vcmp.lt.s32.totalorder %v1290_v6, %v2692_v55 }
 0x1a1   : > { %v1814_v10 = vpop.f32.mrb[16].mxu0  ;;  %1891 = vmatmul.mubr.bf16.gmra.mrb[4].mxu1 %v829_v8 }
 0x1a2   : > { %v1815_v11 = vpop.f32.mrb[17].mxu0  ;;  %1911 = vmatpush3.bf16.msra.mxu1 %v2106_v5  ;;  %v1292_v5 = vadd.s32 %v2685_v50, %v1275_v59  ;;  %v1282_v59 = vadd.s32 104, %v2681_v49 }
 0x1a3   : > { %v1816_v12 = vadd.f32 %v1815_v11, %v1814_v10  ;;  %v1817_v13 = vpop.f32.mrb[18].mxu0  ;;  %1912 = vmatprep.subr.bf16.mxu1 %v2107_v9  ;;  %v1293_v10 = vadd.s32 %v2685_v50, %v1276_v62 }
 0x1a4   : > { %v1818_v15 = vpop.f32.mrb[19].mxu0  ;;  %vm1309_vm5 = vcmp.lt.s32.totalorder %v1292_v5, %v2692_v55 }
 0x1a5   : > { %v1819_v16 = vadd.f32 %v1818_v15, %v1817_v13  ;;  %vm1310_vm6 = vcmp.lt.s32.totalorder %v1293_v10, %v2692_v55 }
 0x1a6   : > { %1913 = vmatpush3.bf16.msra.mxu1 %v2107_v9 }
 0x1a7   : > { %v830_v17 = vpack.c.bf16 %v1819_v16, %v1816_v12  ;;  %1914 = vmatprep.subr.bf16.mxu1 %v2108_v14  ;;  %v1279_v16 = vadd.s32 80, %v2681_v49 }
 0x1a9   : > { %v1820_v19 = vpop.f32.mrb[20].mxu0  ;;  %1894 = vmatprep.mubr.bf16.mxu1 %v830_v17  ;;  %v1277_v17 = vadd.s32 64, %v2681_v49 }
 0x1aa   : > { %v1821_v20 = vpop.f32.mrb[21].mxu0  ;;  %1915 = vmatpush3.bf16.msra.mxu1 %v2108_v14  ;;  %v1291_v14 = vadd.s32 %v2685_v50, %v1274_v0 }
 0x1ab   : > { %v1822_v21 = vadd.f32 %v1821_v20, %v1820_v19  ;;  %v1823_v22 = vpop.f32.mrb[22].mxu0  ;;  %1916 = vmatprep.subr.bf16.mxu1 %v2109_v18 }
 0x1ac   : > { %v1824_v23 = vpop.f32.mrb[23].mxu0  ;;  %vm1308_vm7 = vcmp.lt.s32.totalorder %v1291_v14, %v2692_v55 }
 0x1ad   : > { %v1825_v24 = vadd.f32 %v1824_v23, %v1823_v22  ;;  %v1278_v22 = vadd.s32 72, %v2681_v49 }
 0x1ae   : > { %1917 = vmatpush3.bf16.msra.mxu1 %v2109_v18 }
 0x1af   : > { %v831_v25 = vpack.c.bf16 %v1825_v24, %v1822_v21 }
 0x1b1   : > { %v1826_v26 = vpop.f32.mrb[24].mxu0  ;;  %1895 = vmatmul.mubr.bf16.gmra.mrb[8].mxu1 %v831_v25 }
 0x1b2   : > { %v1827_v27 = vpop.f32.mrb[25].mxu0 }
 0x1b3   : > { %v1828_v28 = vadd.f32 %v1827_v27, %v1826_v26  ;;  %v1829_v29 = vpop.f32.mrb[26].mxu0 }
 0x1b4   : > { %v1830_v30 = vpop.f32.mrb[27].mxu0 }
 0x1b5   : > { %v1831_v31 = vadd.f32 %v1830_v30, %v1829_v29  ;;  %v1296_v29 = vadd.s32 %v2685_v50, %v1279_v16  ;;  %v1294_v30 = vadd.s32 %v2685_v50, %v1277_v17 }
 0x1b7   : > { %v832_v32 = vpack.c.bf16 %v1831_v31, %v1828_v28  ;;  %v1280_v31 = vadd.s32 88, %v2681_v49  ;;  %vm1311_vm8 = vcmp.lt.s32.totalorder %v1294_v30, %v2692_v55  ;;  %vm1313_vm9 = vcmp.lt.s32.totalorder %v1296_v29, %v2692_v55 }
 0x1b9   : > { %v1832_v33 = vpop.f32.mrb[28].mxu0  ;;  %1898 = vmatprep.mubr.bf16.mxu1 %v832_v32 }
 0x1ba   : > { %v1833_v34 = vpop.f32.mrb[29].mxu0 }
 0x1bb   : > { %v1834_v35 = vadd.f32 %v1833_v34, %v1832_v33  ;;  %v1835_v36 = vpop.f32.mrb[30].mxu0 }
 0x1bc   : > { %v1836_v37 = vpop.f32.mrb[31].mxu0 }
 0x1bd   : > { %v1837_v38 = vadd.f32 %v1836_v37, %v1835_v36 }
 0x1bf   : > { %v833_v40 = vpack.c.bf16 %v1837_v38, %v1834_v35 }
 0x1c1   : > { %1899 = vmatmul.mubr.bf16.gmra.mrb[12].mxu1 %v833_v40  ;;  %v1295_v40 = vadd.s32 %v2685_v50, %v1278_v22 }
 0x1c2   : > { %1918 = vmatprep.mubr.bf16.mxu1 %v2110_v39 }
 0x1c3   : > { %vm1312_vm10 = vcmp.lt.s32.totalorder %v1295_v40, %v2692_v55 }
 0x1c9   : > { %1919 = vmatmul.mubr.bf16.vlgmr.msra.gmra.mrb[0].mxu1 %v2111_v41 }
 0x1ca   : > { %1922 = vmatprep.mubr.bf16.mxu1 %v2112_v42 }
 0x1d1   : > { %1923 = vmatmul.mubr.bf16.gmra.mrb[4].mxu1 %v2113_v43 }
 0x1d2   : > { %1926 = vmatprep.mubr.bf16.mxu1 %v2114_v44 }
 0x1d9   : > { %1927 = vmatmul.mubr.bf16.gmra.mrb[8].mxu1 %v2115_v45  ;;  %v1297_v45 = vadd.s32 %v2685_v50, %v1280_v31 }
 0x1da   : > { %1930 = vmatprep.mubr.bf16.mxu1 %v2116_v46  ;;  %v1281_v46 = vadd.s32 96, %v2681_v49 }
 0x1db   : > { %vm1314_vm11 = vcmp.lt.s32.totalorder %v1297_v45, %v2692_v55 }
 0x1dc   : > { %v1298_v62 = vadd.s32 %v2685_v50, %v1281_v46 }
 0x1de   : > { %vm1315_vm12 = vcmp.lt.s32.totalorder %v1298_v62, %v2692_v55 }
 0x1e1   : > { %1931 = vmatmul.mubr.bf16.gmra.mrb[12].mxu1 %v2117_v47 }
 0x29c   : > { %v1920_v61 = vpop.f32.mrb[0].mxu1 }
 0x29d   : > { %v1125_v63 = vpop.f32.mrb[1].mxu1  ;;  %v1353_v7 = vsel %vm1305_vm1, %v1920_v61, 0.0 }
 0x29e   : > { %v1351_v1 = vsel %vm1303_vm0, %v1125_v63, 0.0  ;;  %v1921_v2 = vpop.f32.mrb[2].mxu1  ;;  %v1390_v18 = vmul.f32 %v1353_v7, %v1353_v7 }
 0x29f   : > { %v1735_v3 = vpack.c.bf16 %v1921_v2, %v1920_v61  ;;  %v1128_v4 = vpop.f32.mrb[3].mxu1  ;;  %v1388_v11 = vmul.f32 %v1351_v1, %v1351_v1  ;;  %v1354_v15 = vsel %vm1306_vm3, %v1921_v2, 0.0 }
 0x2a0   : > { %v1730_v8 = vpack.c.bf16 %v1128_v4, %v1125_v63  ;;  %v1352_v9 = vsel %vm1304_vm2, %v1128_v4, 0.0  ;;  %v1391_v23 = vmul.f32 %v1354_v15, %v1354_v15  ;;  %v1284_v63 = vadd.s32 120, %v2681_v49 }
 0x2a1   : > { %1767 = vst [vmem:[%s2709_s18 + $0x8] sm:$0xff] %v1735_v3   ;;  %v1367_v12 = vadd.f32 %v1352_v9, %v1351_v1  ;;  %v1389_v13 = vmul.f32 %v1352_v9, %v1352_v9 }
 0x2a2   : > { %1731 = vst [vmem:[%s2709_s18] sm:$0xff] %v1730_v8   ;;  %v1300_v8 = vadd.s32 %v2685_v50, %v1283_v53 }
 0x2a3   : > { %v1368_v19 = vadd.f32 %v1367_v12, %v1353_v7  ;;  %v1404_v20 = vadd.f32 %v1389_v13, %v1388_v11  ;;  %v1299_v11 = vadd.s32 %v2685_v50, %v1282_v59  ;;  %v1301_v13 = vadd.s32 %v2685_v50, %v1284_v63 }
 0x2a4   : > { %v1924_v21 = vpop.f32.mrb[4].mxu1  ;;  %vm1317_vm13 = vcmp.lt.s32.totalorder %v1300_v8, %v2692_v55 }
 0x2a5   : > { %v1405_v24 = vadd.f32 %v1404_v20, %v1390_v18  ;;  %v1141_v25 = vpop.f32.mrb[5].mxu1  ;;  %v1369_v26 = vadd.f32 %v1368_v19, %v1354_v15  ;;  %v1357_v37 = vsel %vm1309_vm5, %v1924_v21, 0.0  ;;  %vm1316_vm14 = vcmp.lt.s32.totalorder %v1299_v11, %v2692_v55 }
 0x2a6   : > { %v1355_v27 = vsel %vm1307_vm4, %v1141_v25, 0.0  ;;  %v1925_v28 = vpop.f32.mrb[6].mxu1  ;;  %v1394_v47 = vmul.f32 %v1357_v37, %v1357_v37  ;;  %vm1318_vm15 = vcmp.lt.s32.totalorder %v1301_v13, %v2692_v55 }
 0x2a7   : > { %v1370_v32 = vadd.f32 %v1369_v26, %v1355_v27  ;;  %v1392_v33 = vmul.f32 %v1355_v27, %v1355_v27  ;;  %v1406_v34 = vadd.f32 %v1405_v24, %v1391_v23  ;;  %v1745_v35 = vpack.c.bf16 %v1925_v28, %v1924_v21  ;;  %v1144_v36 = vpop.f32.mrb[7].mxu1 }
 0x2a8   : > { %v1740_v38 = vpack.c.bf16 %v1144_v36, %v1141_v25  ;;  %v1356_v39 = vsel %vm1308_vm7, %v1144_v36, 0.0  ;;  %v1358_v44 = vsel %vm1310_vm6, %v1925_v28, 0.0 }
 0x2a9   : > { %v1407_v41 = vadd.f32 %v1406_v34, %v1392_v33  ;;  %1769 = vst [vmem:[%s2709_s18 + $0x18] sm:$0xff] %v1745_v35   ;;  %v1371_v42 = vadd.f32 %v1370_v32, %v1356_v39  ;;  %v1393_v43 = vmul.f32 %v1356_v39, %v1356_v39  ;;  %v1395_v54 = vmul.f32 %v1358_v44, %v1358_v44 }
 0x2aa   : > { %1768 = vst [vmem:[%s2709_s18 + $0x10] sm:$0xff] %v1740_v38  }
 0x2ab   : > { %v1372_v48 = vadd.f32 %v1371_v42, %v1357_v37  ;;  %v1408_v51 = vadd.f32 %v1407_v41, %v1393_v43 }
 0x2ac   : > { %v1928_v52 = vpop.f32.mrb[8].mxu1 }
 0x2ad   : > { %v1409_v56 = vadd.f32 %v1408_v51, %v1394_v47  ;;  %v1157_v57 = vpop.f32.mrb[9].mxu1  ;;  %v1373_v58 = vadd.f32 %v1372_v48, %v1358_v44  ;;  %v1361_v5 = vsel %vm1313_vm9, %v1928_v52, 0.0 }
 0x2ae   : > { %v1359_v60 = vsel %vm1311_vm8, %v1157_v57, 0.0  ;;  %v1929_v61 = vpop.f32.mrb[10].mxu1  ;;  %v1398_v14 = vmul.f32 %v1361_v5, %v1361_v5 }
 0x2af   : > { %v1374_v0 = vadd.f32 %v1373_v58, %v1359_v60  ;;  %v1396_v1 = vmul.f32 %v1359_v60, %v1359_v60  ;;  %v1410_v2 = vadd.f32 %v1409_v56, %v1395_v54  ;;  %v1755_v3 = vpack.c.bf16 %v1929_v61, %v1928_v52  ;;  %v1160_v4 = vpop.f32.mrb[11].mxu1 }
 0x2b0   : > { %v1750_v6 = vpack.c.bf16 %v1160_v4, %v1157_v57  ;;  %v1360_v7 = vsel %vm1312_vm10, %v1160_v4, 0.0  ;;  %v1362_v12 = vsel %vm1314_vm11, %v1929_v61, 0.0 }
 0x2b1   : > { %v1411_v9 = vadd.f32 %v1410_v2, %v1396_v1  ;;  %1771 = vst [vmem:[%s2709_s18 + $0x28] sm:$0xff] %v1755_v3   ;;  %v1375_v49 = vadd.f32 %v1374_v0, %v1360_v7  ;;  %v1397_v10 = vmul.f32 %v1360_v7, %v1360_v7  ;;  %v1399_v18 = vmul.f32 %v1362_v12, %v1362_v12 }
 0x2b2   : > { %1770 = vst [vmem:[%s2709_s18 + $0x20] sm:$0xff] %v1750_v6  }
 0x2b3   : > { %v1376_v15 = vadd.f32 %v1375_v49, %v1361_v5  ;;  %v1412_v16 = vadd.f32 %v1411_v9, %v1397_v10 }
 0x2b4   : > { %v1932_v17 = vpop.f32.mrb[12].mxu1 }
 0x2b5   : > { %v1413_v19 = vadd.f32 %v1412_v16, %v1398_v14  ;;  %v1173_v20 = vpop.f32.mrb[13].mxu1  ;;  %v1377_v21 = vadd.f32 %v1376_v15, %v1362_v12  ;;  %v1365_v28 = vsel %vm1317_vm13, %v1932_v17, 0.0 }
 0x2b6   : > { %v1363_v50 = vsel %vm1315_vm12, %v1173_v20, 0.0  ;;  %v1933_v22 = vpop.f32.mrb[14].mxu1  ;;  %v1402_v35 = vmul.f32 %v1365_v28, %v1365_v28 }
 0x2b7   : > { %v1378_v23 = vadd.f32 %v1377_v21, %v1363_v50  ;;  %v1400_v24 = vmul.f32 %v1363_v50, %v1363_v50  ;;  %v1414_v25 = vadd.f32 %v1413_v19, %v1399_v18  ;;  %v1765_v26 = vpack.c.bf16 %v1933_v22, %v1932_v17  ;;  %v1176_v27 = vpop.f32.mrb[15].mxu1 }
 0x2b8   : > { %v1760_v29 = vpack.c.bf16 %v1176_v27, %v1173_v20  ;;  %v1364_v30 = vsel %vm1316_vm14, %v1176_v27, 0.0  ;;  %v1366_v34 = vsel %vm1318_vm15, %v1933_v22, 0.0 }
 0x2b9   : > { %v1415_v31 = vadd.f32 %v1414_v25, %v1400_v24  ;;  %1773 = vst [vmem:[%s2709_s18 + $0x38] sm:$0xff] %v1765_v26   ;;  %v1379_v32 = vadd.f32 %v1378_v23, %v1364_v30  ;;  %v1401_v33 = vmul.f32 %v1364_v30, %v1364_v30 }
 0x2ba   : > { %1772 = vst [vmem:[%s2709_s18 + $0x30] sm:$0xff] %v1760_v29  }
 0x2bb   : > { %v1380_v36 = vadd.f32 %v1379_v32, %v1365_v28  ;;  %v1416_v37 = vadd.f32 %v1415_v31, %v1401_v33 }
 0x2bc   : > { %2245 = shalt.err (!%p2242_p0)
}
 0x2bd   : > { %s2246_s14 = scalar_lea.hbm %s2763_s21, 1024  ;;  %s2250_s17 = scalar_lea.hbm %s2854_s7, 2048 }
 0x2be   : > { %p2247_p4 = scmp.ne.s32.totalorder %s2763_s21, %s2246_s14  ;;  %p2251_p12 = scmp.lt.u32.totalorder %s2763_s21, %s2854_s7 }
 0x2bf   : > { %p2252_p1 = scmp.lt.u32.totalorder %s2250_s17, %s2246_s14  ;;  %p2254_p13 = scmp.lt.u32.totalorder %s2246_s14, %s2763_s21 }
 0x2c0   : > { %p2248_p2 = pnand %p2247_p4, %p2576_p10 }
 0x2c1   : > { %p2253_p11 = por %p2252_p1, %p2251_p12 }
 0x2c2   : > { %p2249_p8 = pneg %p2248_p2 }
 0x2c3   : > { %p2255_p6 = por %p2254_p13, %p2253_p11 }
 0x2c5   : > { %p2256_p3 = pnand %p2255_p6, %p2249_p8 }
 0x2c7   : > { %2259 = shalt.err (!%p2256_p3)
}
 0x2c8   : > { %s2365_s27 = smov 64   ;;  %s2366_s28 = smov 4   ;;  %v1403_v55 = vmul.f32 %v1366_v34, %v1366_v34  ;;  %v1381_v38 = vadd.f32 %v1380_v36, %v1366_v34  ;;  %v1417_v39 = vadd.f32 %v1416_v37, %v1402_v35  ;;  %vm1425_vm0 = vcmask 1040384  }
 0x2c9   : > { %1964 = dma.vmem_to_hbm [thread:$0]  (%p2576_p10), %s2757_s25, 1024, %s2763_s21, %s1429_s5, %s2365_s27, %s2365_s27, %s2366_s28  }
 0x2ca   : > { %v1382_v40 = vrot.slane %v1381_v38, 4  ;;  %v1418_v41 = vadd.f32 %v1417_v39, %v1403_v55  ;;  %s1626_s11 = sshll.u32 %s2634_s0, 1  ;;  %s1705_s26 = sshll.u32 %s2346_s30, 5 }
 0x2cb   : > { %s370_s25 = scalar_lea.vmem [#allocation14], %s1626_s11  ;;  %s2798_s22 = scalar_lea.hbm %s2855_s8, %s1705_s26 }
 0x2cc   : > { %v1383_v42 = vadd.f32 %v1382_v40, %v1381_v38  ;;  %v1419_v43 = vrot.slane %v1418_v41, 4  ;;  %s1463_s21 = sshll.u32 %s370_s25, 4  ;;  %s1434_s12 = scalar_lea.sflag [#allocation15], %s2634_s0  ;;  %s2800_s21 = int_to_ptr.vmem [resolvable:$true] %s1463_s21 }
 0x2cd   : > { %s2260_s14 = scalar_lea.vmem %s2800_s21, 32  ;;  %s2367_s30 = smov [#allocation14]  }
 0x2ce   : > { %v1384_v44 = vrot.slane %v1383_v42, 2  ;;  %v1420_v45 = vadd.f32 %v1419_v43, %v1418_v41  ;;  %p2261_p5 = scmp.ne.s32.totalorder %s2800_s21, %s2260_s14  ;;  %s2264_s16 = sshll.u32 %s2367_s30, 4  ;;  %s2265_s16 = int_to_ptr.vmem [resolvable:$false] %s2264_s16 }
 0x2cf   : > { %s2266_s13 = scalar_lea.vmem %s2265_s16, 64  ;;  %p2267_p0 = scmp.lt.s32.totalorder %s2800_s21, %s2265_s16 }
 0x2d0   : > { %v1385_v46 = vadd.f32 %v1384_v44, %v1383_v42  ;;  %v1421_v47 = vrot.slane %v1420_v45, 2  ;;  %p2262_p7 = pnand %p2261_p5, %p2576_p10  ;;  %p2268_p4 = scmp.lt.s32.totalorder %s2266_s13, %s2260_s14 }
 0x2d2   : > { %v1386_v48 = vrot.slane %v1385_v46, 1  ;;  %v1422_v51 = vadd.f32 %v1421_v47, %v1420_v45  ;;  %p2263_p9 = pneg %p2262_p7  ;;  %p2269_p2 = por %p2268_p4, %p2267_p0 }
 0x2d4   : > { %v1423_v52 = vrot.slane %v1422_v51, 1  ;;  %v1387_v53 = vadd.f32 %v1386_v48, %v1385_v46  ;;  %p2270_p8 = pnand %p2269_p2, %p2263_p9 }
 0x2d6   : > { %v1424_v54 = vadd.f32 %v1423_v52, %v1422_v51 }
 0x2d8   : > { %v1426_v56 = vsel %vm1425_vm0, %v1387_v53, %v1424_v54 }
 0x2d9   : > { %1427 = vst [vmem:[%s370_s25] sm:$0x3] %v1426_v56 }
 0x2da   : > { %2273 = shalt.err (!%p2270_p8)
}
 0x2db   : > { %s2274_s0 = scalar_lea.hbm %s2798_s22, 32  ;;  %s2278_s18 = scalar_lea.hbm %s2855_s8, 64 }
 0x2dc   : > { %p2275_p12 = scmp.ne.s32.totalorder %s2798_s22, %s2274_s0  ;;  %p2279_p13 = scmp.lt.u32.totalorder %s2798_s22, %s2855_s8 }
 0x2dd   : > { %p2280_p6 = scmp.lt.u32.totalorder %s2278_s18, %s2274_s0  ;;  %p2282_p5 = scmp.lt.u32.totalorder %s2274_s0, %s2798_s22 }
 0x2de   : > { %p2276_p1 = pnand %p2275_p12, %p2576_p10 }
 0x2df   : > { %p2281_p3 = por %p2280_p6, %p2279_p13 }
 0x2e0   : > { %p2277_p11 = pneg %p2276_p1 }
 0x2e1   : > { %p2283_p7 = por %p2282_p5, %p2281_p3 }
 0x2e3   : > { %p2284_p9 = pnand %p2283_p7, %p2277_p11 }
 0x2e5   : > { %2287 = shalt.err (!%p2284_p9)
}
 0x2e6   : > { %1965 = dma.vmem_to_hbm [thread:$0]  (%p2576_p10), %s2800_s21, 32, %s2798_s22, %s1434_s12  }
 0x2e7 PF: > { %s2877_s11 = sld [smem:[#allocation21_spill]]  ;;  %s2878_s26 = sld [smem:[#allocation22_spill]] }
 0x2e8   : > { %p2880_p4 = scmp.ge.s32.totalorder %s2354_s10, 2 }
 0x2ed   : > { %s1475_s25 = sand.u32 1, %s2877_s11   ;;  %p2879_p0 = scmp.ne.s32.totalorder %s2878_s26, 0 }
 0x2ee   : > { %s1476_s5 = scalar_lea.sflag [#allocation7], %s1475_s25 }
 0x2ef   : > { %p1983_p2 = pnand %p2880_p4, %p2879_p0 }
 0x2f1   : > { %2325 = dma.done.wait (!%p1983_p2), %s1476_s5, 1024  }
 0x2f2   : > { %2327 = vsyncadd (!%p1983_p2), %s1476_s5, 4294966272  ;;  %s1485_s23 = scalar_lea.sflag [#allocation15], %s1475_s25 }
 0x2f3   : > { %2329 = dma.done.wait (!%p1983_p2), %s1485_s23, 32  }
 0x2f4   : > { %2331 = vsyncadd (!%p1983_p2), %s1485_s23, 4294967264  ;;  %s31_s10 = sadd.s32 1, %s2354_s10   ;;  %s2881_s5 = smov %s2338_s6 }
 0x2f5   : > { %p28_p8 = scmp.ge.s32.totalorder %s31_s10, 4   ;;  %s2882_s6 = smov %s2342_s29 }
 0x2f6   : > { %s2883_s29 = smov %s2588_s24  ;;  %s2884_s30 = smov %s2350_s9 }
 0x2f7   : > { %s2885_s9 = smov %s2887_s19  ;;  %30 = sbr.rel (!%p28_p8) target bundleno = 12 (0xc), region = 128 }
 0x2fe   :  { %1490 = vsyncpa [#allocation6], 1 }
 0x2ff   :  { %1492 = vsyncpa [#allocation6 + $0x1], 1 }
 0x300   :  { %1493 = vsyncpa [#allocation9], 1 }
 0x301   :  { %1494 = vsyncpa [#allocation12], 1 }
 0x302   :  { %1495 = vsyncpa [#allocation7], 1 }
 0x303   :  { %1497 = vsyncpa [#allocation7 + $0x1], 1 }
 0x304   :  { %1498 = vsyncpa [#allocation15], 1 }
 0x305   :  { %1500 = vsyncpa [#allocation15 + $0x1], 1 }

</bundles_post_ra>
